<compile_context>
chip_gen: v6e
topology: v6e:2x2x1
jax: 0.10.0
libtpu: 0.0.40
codegen_flags: <defaults>
</compile_context>

<pallas_src>
import math

import jax
import jax.numpy as jnp
from jax import lax
from jax.experimental import pallas as pl
from jax.experimental.pallas import tpu as pltpu

_LANES = 128
_SUBLANES = 8
_TARGET_BLOCK_BYTES = 2 * 1024 * 1024      # per-input block (f32 -> tr=4096, bf16 -> tr=8192)
_VMEM_LIMIT_BYTES = 40 * 1024 * 1024       # safe on v5e/v6e (128 MiB phys) and v7x (64 MiB phys)


def _bce_with_logits_mean(prediction, target):
    """Fused jnp reference / small-input bypass (numerically-stable BCE-with-logits)."""
    x = prediction.astype(jnp.float32)
    y = target.astype(jnp.float32)
    per = jnp.maximum(x, 0.0) - x * y + jnp.log1p(jnp.exp(-jnp.abs(x)))
    return jnp.mean(per)


def _default_num_shards(blocks_needed: int) -> int:
    """Shard count for the leading 'parallel' grid axis (TensorCore count if known)."""
    if blocks_needed < 2:
        return 1
    cores = 2  # fallback: near-free extra loop on single-TC chips, needed on v7x
    try:
        info = pltpu.get_tpu_info()
        for name in ("num_cores", "core_count", "num_tensorcores", "tensorcore_count"):
            v = getattr(info, name, None)
            if isinstance(v, int) and v >= 1:
                cores = v
                break
    except Exception:
        pass
    return max(1, min(cores, blocks_needed))


def _make_kernel(tr: int, blocks_per_shard: int, n_valid: int):
    block_elems = tr * _LANES

    def kernel(pred_ref, tgt_ref, out_ref, acc_ref):
        i = pl.program_id(0)          # shard axis ("parallel")
        j = pl.program_id(1)          # reduction axis ("arbitrary")

        @pl.when(j == 0)
        def _init():
            acc_ref[...] = jnp.zeros_like(acc_ref)

        blk = i * blocks_per_shard + j                 # logical block index (unclamped)
        rem = n_valid - blk * block_elems              # #valid elements left at this block

        def accumulate(masked: bool):
            # Numerically-stable BCE-with-logits (matches PyTorch):
            #   loss(x, y) = max(x, 0) - x*y + log1p(exp(-|x|))
            x = pred_ref[...].astype(jnp.float32)
            y = tgt_ref[...].astype(jnp.float32)
            per = jnp.maximum(x, 0.0) - x * y + jnp.log1p(jnp.exp(-jnp.abs(x)))
            if masked:
                idx = (lax.broadcasted_iota(jnp.int32, (tr, _LANES), 0) * _LANES
                       + lax.broadcasted_iota(jnp.int32, (tr, _LANES), 1))
                per = jnp.where(idx < rem, per, 0.0)
            # Lane-local partial sum into the resident (8,128) accumulator
            # (pure VPU adds; no cross-lane traffic in the steady state).
            acc_ref[...] += per.reshape(tr // _SUBLANES, _SUBLANES, _LANES).sum(axis=0)

        # Fast path: fully-valid block -> no iota / compare / select.
        @pl.when(rem >= block_elems)
        def _full():
            accumulate(False)

        # Slow path: partial tail block (0 < rem < block_elems) OR pad-only /
        # clamped over-coverage block (rem <= 0, masked entirely to zero).
        @pl.when(rem < block_elems)
        def _partial():
            accumulate(True)

        # Epilogue: one cross-lane reduce + one SMEM scalar store per shard.
        @pl.when(j == pl.num_programs(1) - 1)
        def _finalize():
            out_ref[0, 0] = jnp.sum(acc_ref[...])

    return kernel


def initial_pair_loss(prediction: jax.Array, target: jax.Array,
                      *, block_rows: int | None = None,
                      num_shards: int | None = None,
                      min_kernel_elems: int = 65536) -> jax.Array:
    """Equivalent of InitialPairLoss.forward: BCEWithLogitsLoss, mean-reduced."""
    assert prediction.shape == target.shape, "prediction/target shape mismatch"

    n = int(math.prod(prediction.shape))
    assert n > 0
    # In-kernel tail-mask offsets are int32; keep element count in range.
    assert n < 2 ** 31, "input too large for int32 tail-mask offsets"

    # Small-input bypass: pallas_call launch + layout plumbing dwarfs the work.
    if n < min_kernel_elems:
        return _bce_with_logits_mean(prediction, target)

    pred_flat = prediction.reshape(-1)
    tgt_flat = target.reshape(-1)

    # Lane-dense layout: flatten into a (rows, 128) slab, rows rounded up to a
    # sublane multiple.  Pad ONLY when necessary, and only minimally; grid
    # over-coverage is handled by a clamped index_map + the in-kernel mask.
    rows_needed = -(-n // _LANES)
    rows_aligned = max(_SUBLANES, -(-rows_needed // _SUBLANES) * _SUBLANES)
    pad = rows_aligned * _LANES - n
    if pad:
        pred_flat = jnp.pad(pred_flat, (0, pad))
        tgt_flat = jnp.pad(tgt_flat, (0, pad))
    pred2d = pred_flat.reshape(rows_aligned, _LANES)   # original dtype: no pre-cast
    tgt2d = tgt_flat.reshape(rows_aligned, _LANES)

    # Tile selection: ~2 MiB per input block (tr=4096 f32 / 8192 bf16).
    if block_rows is None:
        itemsize = max(jnp.dtype(prediction.dtype).itemsize,
                       jnp.dtype(target.dtype).itemsize)
        block_rows = max(_SUBLANES,
                         (_TARGET_BLOCK_BYTES // (_LANES * itemsize))
                         // _SUBLANES * _SUBLANES)
    tr = max(_SUBLANES, (min(block_rows, rows_aligned) // _SUBLANES) * _SUBLANES)
    blocks_needed = -(-rows_aligned // tr)

    if num_shards is None:
        num_shards = _default_num_shards(blocks_needed)
    num_shards = max(1, min(num_shards, blocks_needed))
    blocks_per_shard = -(-blocks_needed // num_shards)

    last_block = blocks_needed - 1

    def in_map(i, j):
        # Clamp so pad-only blocks (shard over-coverage) just re-read the last
        # in-bounds block; the in-kernel rem<=0 mask zeroes their contribution.
        return (jnp.minimum(i * blocks_per_shard + j, last_block), 0)

    partials = pl.pallas_call(
        _make_kernel(tr, blocks_per_shard, n),
        out_shape=jax.ShapeDtypeStruct((num_shards, 1), jnp.float32),
        grid_spec=pltpu.PrefetchScalarGridSpec(
            num_scalar_prefetch=0,
            grid=(num_shards, blocks_per_shard),
            in_specs=[
                pl.BlockSpec((tr, _LANES), in_map),
                pl.BlockSpec((tr, _LANES), in_map),
            ],
            out_specs=pl.BlockSpec((1, 1), lambda i, j: (i, 0),
                                   memory_space=pltpu.MemorySpace.SMEM),
            scratch_shapes=[pltpu.VMEM((_SUBLANES, _LANES), jnp.float32)],
        ),
        compiler_params=pltpu.CompilerParams(
            dimension_semantics=("parallel", "arbitrary"),
            vmem_limit_bytes=_VMEM_LIMIT_BYTES),
    )(pred2d, tgt2d)

    # Finish the mean outside the kernel (divide by the ORIGINAL element count).
    return jnp.sum(partials) / n


if __name__ == "__main__":
    key = jax.random.PRNGKey(0)
    k1, k2, k3, k4, k5, k6, k7, k8 = jax.random.split(key, 8)

    # Case 1: the module's pairwise-ranking shape [N, 2] (N = 8 pairs),
    # forced through the kernel path (masked partial block).
    pred1 = jax.random.normal(k1, (8, 2), dtype=jnp.float32)
    tgt1 = jax.random.bernoulli(k2, p=0.5, shape=(8, 2)).astype(jnp.float32)
    out1 = jax.block_until_ready(initial_pair_loss(pred1, tgt1, min_kernel_elems=0))
    ref1 = _bce_with_logits_mean(pred1, tgt1)
    assert jnp.allclose(out1, ref1, atol=1e-5, rtol=1e-5), (out1, ref1)

    # Same inputs through the small-input bypass (default threshold).
    out1b = jax.block_until_ready(initial_pair_loss(pred1, tgt1))
    assert jnp.allclose(out1b, ref1, atol=1e-5, rtol=1e-5), (out1b, ref1)

    # Case 2: bf16, unaligned tail, forced small tiles -> multi-shard multi-block
    # path with a masked partial block and a clamped pad-only block.
    pred2 = jax.random.normal(k3, (64, 40), dtype=jnp.bfloat16)
    tgt2 = jax.random.bernoulli(k4, p=0.5, shape=(64, 40)).astype(jnp.bfloat16)
    out2 = jax.block_until_ready(
        initial_pair_loss(pred2, tgt2, block_rows=8, num_shards=2, min_kernel_elems=0))
    ref2 = _bce_with_logits_mean(pred2, tgt2)
    assert jnp.allclose(out2, ref2, atol=2e-3, rtol=2e-3), (out2, ref2)

    # Case 3: (8,128)-aligned f32 -> zero-pad-free path, unmasked fast path only,
    # default shard selection (exercises _default_num_shards).
    pred3 = jax.random.normal(k5, (128, 256), dtype=jnp.float32)
    tgt3 = jax.random.bernoulli(k6, p=0.5, shape=(128, 256)).astype(jnp.float32)
    out3 = jax.block_until_ready(
        initial_pair_loss(pred3, tgt3, block_rows=64, min_kernel_elems=0))
    ref3 = _bce_with_logits_mean(pred3, tgt3)
    assert jnp.allclose(out3, ref3, atol=1e-5, rtol=1e-5), (out3, ref3)

    # Case 4: block shape that does not divide the row count -> boundary block
    # with out-of-bounds rows, fully handled by the in-kernel mask.
    pred4 = jax.random.normal(k7, (40, 64), dtype=jnp.float32)
    tgt4 = jax.random.bernoulli(k8, p=0.5, shape=(40, 64)).astype(jnp.float32)
    out4 = jax.block_until_ready(
        initial_pair_loss(pred4, tgt4, block_rows=16, num_shards=2, min_kernel_elems=0))
    ref4 = _bce_with_logits_mean(pred4, tgt4)
    assert jnp.allclose(out4, ref4, atol=1e-5, rtol=1e-5), (out4, ref4)

    print("KERNEL_OK")
</pallas_src>

<mosaic_0001>
module attributes {stable_mosaic.version = 11 : i64} {
  func.func @kernel(%arg0: i32, %arg1: i32, %arg2: memref<8x128xf32, #tpu.memory_space<vmem>>, %arg3: memref<8x128xf32, #tpu.memory_space<vmem>>, %arg4: memref<1x1xf32, #tpu.memory_space<smem>>, %arg5: memref<8x128xf32, #tpu.memory_space<vmem>>) attributes {dimension_semantics = [#tpu.dimension_semantics<parallel>, #tpu.dimension_semantics<arbitrary>], iteration_bounds = array<i64: 1, 1>, scalar_prefetch = 0 : i64, scratch_operands = 1 : i64, tpu.core_type = #tpu.core_type<tc>, window_params = [{transform_indices = @transform_0, window_bounds = array<i64: 8, 128>}, {transform_indices = @transform_1, window_bounds = array<i64: 8, 128>}, {transform_indices = @transform_2, window_bounds = array<i64: 1, 1>}]} {
    %c0_i32 = arith.constant 0 : i32
    %0 = arith.cmpi eq, %arg1, %c0_i32 : i32
    %1 = arith.extui %0 : i1 to i32
    %c0_i32_0 = arith.constant 0 : i32
    %2 = arith.cmpi ne, %1, %c0_i32_0 : i32
    scf.if %2 {
      %cst = arith.constant 0.000000e+00 : f32
      %16 = vector.broadcast %cst : f32 to vector<8x128xf32>
      %c0 = arith.constant 0 : index
      %c0_7 = arith.constant 0 : index
      %17 = vector.load %arg5[%c0, %c0_7] : memref<8x128xf32, #tpu.memory_space<vmem>>, vector<8x128xf32>
      tpu.vector_store %arg5[%c0, %c0_7], %16 {strides = array<i32>} : memref<8x128xf32, #tpu.memory_space<vmem>>, vector<8x128xf32>,
    } else {
    }
    %c1_i32 = arith.constant 1 : i32
    %3 = arith.muli %arg0, %c1_i32 : i32
    %4 = arith.addi %3, %arg1 : i32
    %c1024_i32 = arith.constant 1024 : i32
    %5 = arith.muli %4, %c1024_i32 : i32
    %c16_i32 = arith.constant 16 : i32
    %6 = arith.subi %c16_i32, %5 : i32
    %c1024_i32_1 = arith.constant 1024 : i32
    %7 = arith.cmpi sge, %6, %c1024_i32_1 : i32
    %8 = arith.extui %7 : i1 to i32
    %c0_i32_2 = arith.constant 0 : i32
    %9 = arith.cmpi ne, %8, %c0_i32_2 : i32
    scf.if %9 {
      %c0 = arith.constant 0 : index
      %c0_7 = arith.constant 0 : index
      %16 = vector.load %arg2[%c0, %c0_7] : memref<8x128xf32, #tpu.memory_space<vmem>>, vector<8x128xf32>
      %c0_8 = arith.constant 0 : index
      %c0_9 = arith.constant 0 : index
      %17 = vector.load %arg3[%c0_8, %c0_9] : memref<8x128xf32, #tpu.memory_space<vmem>>, vector<8x128xf32>
      %cst = arith.constant 0.000000e+00 : f32
      %18 = vector.broadcast %cst : f32 to vector<8x128xf32>
      %19 = arith.maximumf %16, %18 : vector<8x128xf32>
      %20 = arith.mulf %16, %17 : vector<8x128xf32>
      %21 = arith.subf %19, %20 : vector<8x128xf32>
      %22 = math.absf %16 : vector<8x128xf32>
      %cst_10 = arith.constant 0.000000e+00 : f32
      %23 = vector.broadcast %cst_10 : f32 to vector<8x128xf32>
      %24 = arith.subf %23, %22 : vector<8x128xf32>
      %25 = math.exp %24 : vector<8x128xf32>
      %26 = math.log1p %25 : vector<8x128xf32>
      %27 = arith.addf %21, %26 : vector<8x128xf32>
      %c0_11 = arith.constant 0 : index
      %c0_12 = arith.constant 0 : index
      %28 = vector.load %arg5[%c0_11, %c0_12] : memref<8x128xf32, #tpu.memory_space<vmem>>, vector<8x128xf32>
      %29 = vector.shape_cast %27 : vector<8x128xf32> to vector<1x8x128xf32>
      %cst_13 = arith.constant dense<0.000000e+00> : vector<8x128xf32>
      %30 = vector.multi_reduction <add>, %29, %cst_13 [0] : vector<1x8x128xf32> to vector<8x128xf32>
      %31 = arith.addf %28, %30 : vector<8x128xf32>
      %c0_14 = arith.constant 0 : index
      %c0_15 = arith.constant 0 : index
      %32 = vector.load %arg5[%c0_14, %c0_15] : memref<8x128xf32, #tpu.memory_space<vmem>>, vector<8x128xf32>
      tpu.vector_store %arg5[%c0_14, %c0_15], %31 {strides = array<i32>} : memref<8x128xf32, #tpu.memory_space<vmem>>, vector<8x128xf32>,
    } else {
    }
    %c1024_i32_3 = arith.constant 1024 : i32
    %10 = arith.cmpi slt, %6, %c1024_i32_3 : i32
    %11 = arith.extui %10 : i1 to i32
    %c0_i32_4 = arith.constant 0 : i32
    %12 = arith.cmpi ne, %11, %c0_i32_4 : i32
    scf.if %12 {
      %c0 = arith.constant 0 : index
      %c0_7 = arith.constant 0 : index
      %16 = vector.load %arg2[%c0, %c0_7] : memref<8x128xf32, #tpu.memory_space<vmem>>, vector<8x128xf32>
      %c0_8 = arith.constant 0 : index
      %c0_9 = arith.constant 0 : index
      %17 = vector.load %arg3[%c0_8, %c0_9] : memref<8x128xf32, #tpu.memory_space<vmem>>, vector<8x128xf32>
      %cst = arith.constant 0.000000e+00 : f32
      %18 = vector.broadcast %cst : f32 to vector<8x128xf32>
      %19 = arith.maximumf %16, %18 : vector<8x128xf32>
      %20 = arith.mulf %16, %17 : vector<8x128xf32>
      %21 = arith.subf %19, %20 : vector<8x128xf32>
      %22 = math.absf %16 : vector<8x128xf32>
      %cst_10 = arith.constant 0.000000e+00 : f32
      %23 = vector.broadcast %cst_10 : f32 to vector<8x128xf32>
      %24 = arith.subf %23, %22 : vector<8x128xf32>
      %25 = math.exp %24 : vector<8x128xf32>
      %26 = math.log1p %25 : vector<8x128xf32>
      %27 = arith.addf %21, %26 : vector<8x128xf32>
      %28 = tpu.iota {dimensions = array<i32: 0>} : vector<8x128xi32>
      %c128_i32 = arith.constant 128 : i32
      %29 = vector.broadcast %c128_i32 : i32 to vector<8x128xi32>
      %30 = arith.muli %28, %29 : vector<8x128xi32>
      %31 = tpu.iota {dimensions = array<i32: 1>} : vector<8x128xi32>
      %32 = arith.addi %30, %31 : vector<8x128xi32>
      %33 = vector.broadcast %6 : i32 to vector<8x128xi32>
      %34 = arith.cmpi slt, %32, %33 : vector<8x128xi32>
      %cst_11 = arith.constant 0.000000e+00 : f32
      %35 = vector.broadcast %cst_11 : f32 to vector<8x128xf32>
      %36 = arith.select %34, %27, %35 : vector<8x128xi1>, vector<8x128xf32>
      %c0_12 = arith.constant 0 : index
      %c0_13 = arith.constant 0 : index
      %37 = vector.load %arg5[%c0_12, %c0_13] : memref<8x128xf32, #tpu.memory_space<vmem>>, vector<8x128xf32>
      %38 = vector.shape_cast %36 : vector<8x128xf32> to vector<1x8x128xf32>
      %cst_14 = arith.constant dense<0.000000e+00> : vector<8x128xf32>
      %39 = vector.multi_reduction <add>, %38, %cst_14 [0] : vector<1x8x128xf32> to vector<8x128xf32>
      %40 = arith.addf %37, %39 : vector<8x128xf32>
      %c0_15 = arith.constant 0 : index
      %c0_16 = arith.constant 0 : index
      %41 = vector.load %arg5[%c0_15, %c0_16] : memref<8x128xf32, #tpu.memory_space<vmem>>, vector<8x128xf32>
      tpu.vector_store %arg5[%c0_15, %c0_16], %40 {strides = array<i32>} : memref<8x128xf32, #tpu.memory_space<vmem>>, vector<8x128xf32>,
    } else {
    }
    %c0_i32_5 = arith.constant 0 : i32
    %13 = arith.cmpi eq, %arg1, %c0_i32_5 : i32
    %14 = arith.extui %13 : i1 to i32
    %c0_i32_6 = arith.constant 0 : i32
    %15 = arith.cmpi ne, %14, %c0_i32_6 : i32
    scf.if %15 {
      %c0 = arith.constant 0 : index
      %c0_7 = arith.constant 0 : index
      %16 = vector.load %arg5[%c0, %c0_7] : memref<8x128xf32, #tpu.memory_space<vmem>>, vector<8x128xf32>
      %17 = vector.shape_cast %16 : vector<8x128xf32> to vector<1x8x128xf32>
      %cst = arith.constant dense<0.000000e+00> : vector<1xf32>
      %18 = vector.multi_reduction <add>, %17, %cst [1, 2] : vector<1x8x128xf32> to vector<1xf32>
      %19 = vector.shape_cast %18 : vector<1xf32> to vector<1x1x1xf32>
      %20 = vector.extract %19[0, 0, 0] : f32 from vector<1x1x1xf32>
      %c0_8 = arith.constant 0 : index
      %c0_9 = arith.constant 0 : index
      %21 = memref.load %arg4[%c0_8, %c0_9] : memref<1x1xf32, #tpu.memory_space<smem>>
      memref.store %20, %arg4[%c0_8, %c0_9] : memref<1x1xf32, #tpu.memory_space<smem>>
    } else {
    }
    return
  }
  func.func @transform_0(%arg0: i32, %arg1: i32) -> (i32, i32) {
    %c1_i32 = arith.constant 1 : i32
    %0 = arith.muli %arg0, %c1_i32 : i32
    %1 = arith.addi %0, %arg1 : i32
    %c0_i32 = arith.constant 0 : i32
    %2 = arith.minsi %1, %c0_i32 : i32
    %c0_i32_0 = arith.constant 0 : i32
    %c0_i32_1 = arith.constant 0 : i32
    return %2, %c0_i32_0 : i32, i32
  }
  func.func @transform_1(%arg0: i32, %arg1: i32) -> (i32, i32) {
    %c1_i32 = arith.constant 1 : i32
    %0 = arith.muli %arg0, %c1_i32 : i32
    %1 = arith.addi %0, %arg1 : i32
    %c0_i32 = arith.constant 0 : i32
    %2 = arith.minsi %1, %c0_i32 : i32
    %c0_i32_0 = arith.constant 0 : i32
    %c0_i32_1 = arith.constant 0 : i32
    return %2, %c0_i32_0 : i32, i32
  }
  func.func @transform_2(%arg0: i32, %arg1: i32) -> (i32, i32) {
    %c0_i32 = arith.constant 0 : i32
    %c0_i32_0 = arith.constant 0 : i32
    return %arg0, %c0_i32 : i32, i32
  }
}

</mosaic_0001>

<bundles_post_ra>
// kernel: tpu_custom_call.1
= control target key start
LH: loop header
LB: loop body
LE: loop exit
PB: predicated region body
PF: predicated region fallthrough
CT: control target
= control target key end

     0   :  { %7 = vsyncpa [#allocation4], 0  ;;  %s247_s0 = inlined_call_operand.hbm [shape: f32[8,128], index: 0, kind: input, shape index: {}]   ;;  %s248_s1 = inlined_call_operand.hbm [shape: f32[8,128], index: 1, kind: input, shape index: {}]   ;;  %s249_s2 = inlined_call_operand.hbm [shape: f32[1,1], index: 2, kind: output, shape index: {}]  }
   0x1   :  { %8 = vsyncpa [#allocation7], 0 }
   0x2   :  { %9 = vsyncpa [#allocation5], 0  ;;  %s220_s9 = smov [#allocation3]   ;;  %s221_s11 = smov [#allocation6]  }
   0x3   :  { %s21_s10 = sshll.u32 %s220_s9, 4  ;;  %s36_s12 = sshll.u32 %s221_s11, 4  ;;  %s22_s10 = int_to_ptr.vmem [resolvable:$true] %s21_s10  ;;  %s37_s12 = int_to_ptr.vmem [resolvable:$true] %s36_s12 }
   0x4   :  { %s174_s13 = scalar_lea.vmem %s22_s10, 128  ;;  %p179_p1 = scmp.lt.s32.totalorder %s22_s10, %s22_s10 }
   0x5   :  { %p175_p0 = scmp.ne.s32.totalorder %s22_s10, %s174_s13  ;;  %p180_p2 = scmp.lt.s32.totalorder %s174_s13, %s174_s13 }
   0x7   :  { %p181_p3 = por %p180_p2, %p179_p1 }
   0x9   :  { %p182_p4 = pnand %p181_p3, %p175_p0 }
   0xb   :  { %185 = shalt.err (!%p182_p4)
}
   0xc   :  { %24 = dma.hbm_to_vmem [thread:$0]  %s247_s0, 128, %s22_s10, [#allocation4]  }
   0xd   :  { %s194_s16 = scalar_lea.vmem %s37_s12, 128  ;;  %p199_p6 = scmp.lt.s32.totalorder %s37_s12, %s37_s12 }
   0xe   :  { %p195_p5 = scmp.ne.s32.totalorder %s37_s12, %s194_s16  ;;  %p200_p7 = scmp.lt.s32.totalorder %s194_s16, %s194_s16 }
  0x10   :  { %p201_p8 = por %p200_p7, %p199_p6 }
  0x12   :  { %p202_p9 = pnand %p201_p8, %p195_p5 }
  0x14   :  { %205 = shalt.err (!%p202_p9)
}
  0x15   :  { %39 = dma.hbm_to_vmem [thread:$0]  %s248_s1, 128, %s37_s12, [#allocation7]  }
  0x16   :  { %214 = dma.done.wait [#allocation4], 128  }
  0x17   :  { %215 = vsyncadd [#allocation4], 4294967168 }
  0x18   :  { %216 = dma.done.wait [#allocation7], 128  }
  0x19   :  { %217 = vsyncadd [#allocation7], 4294967168  ;;  %v91_v0 = vld [vmem:[#allocation3] sm:$0xff]  ;;  %v110_v6 = vlaneseq  ;;  %v92_v9 = vld [vmem:[#allocation6] sm:$0xff]  ;;  %s222_s1 = smov [#allocation8]  }
  0x1a   :  { %v96_v1 = vand.u32 2147483647, %v91_v0  ;;  %v93_v13 = vmax.f32 %v91_v0, 0.0  ;;  %v94_v14 = vmul.f32 %v92_v9, %v91_v0 }
  0x1b   :  { %v111_v8 = vshrl.u32 %v110_v6, 7  ;;  %v114_v12 = vand.u32 127, %v110_v6 }
  0x1c   :  { %v97_v2 = vsub.f32 0.0, %v96_v1  ;;  %v95_v19 = vsub.f32 %v93_v13, %v94_v14 }
  0x1d   :  { %v112_v11 = vmul.u32 128, %v111_v8 }
  0x1e   :  { %v98_v3 = vmul.f32 1.442695, %v97_v2 }
  0x1f   :  { %v115_v17 = vadd.s32 %v114_v12, %v112_v11 }
  0x20   :  { %162 = vpow2.f32 %v98_v3 }
  0x21   :  { %vm117_vm1 = vcmp.lt.s32.totalorder %v115_v17, 16 }
  0x2d   :  { %v163_v4 = vpop.eup %162 }
  0x2e   :  { %v100_v5 = vadd.f32 1.0, %v163_v4  ;;  %v103_v7 = vmul.f32 -0.5, %v163_v4  ;;  %v106_v15 = vand.u32 2147483647, %v163_v4 }
  0x30   :  { %164 = vlog2.f32 %v100_v5  ;;  %v104_v10 = vadd.f32 1.0, %v103_v7  ;;  %vm107_vm0 = vcmp.lt.f32.partialorder %v106_v15, 0.0004427343 }
  0x32   :  { %v105_v16 = vmul.f32 %v163_v4, %v104_v10 }
  0x3d   :  { %v165_v18 = vpop.eup %164 }
  0x3e   :  { %v102_v20 = vmul.f32 0.6931472, %v165_v18 }
  0x40   :  { %v108_v21 = vsel %vm107_vm0, %v105_v16, %v102_v20 }
  0x41   :  { %v109_v22 = vadd.f32 %v108_v21, %v95_v19 }
  0x43   :  { %v118_v23 = vsel %vm117_vm1, %v109_v22, 0.0 }
  0x44   :  { %127 = vadd.xlane.f32.xlu0 %v118_v23 }
  0xcd   :  { %v128_v24 = vpop.xlane.xlu0 %127 }
  0xce   :  { %v129_v25 = vrot.slane %v128_v24, 4 }
  0xd0   :  { %v130_v26 = vadd.f32 %v129_v25, %v128_v24 }
  0xd2   :  { %v131_v27 = vrot.slane %v130_v26, 2 }
  0xd4   :  { %v132_v28 = vadd.f32 %v131_v27, %v130_v26 }
  0xd6   :  { %v133_v29 = vrot.slane %v132_v28, 1 }
  0xd8   :  { %v134_v30 = vadd.f32 %v133_v29, %v132_v28 }
  0xda   :  { %157 = vpush %v134_v30 }
 0x10b   :  { %s158_s0 = spop %157 }
 0x10c   :  { %137 = sst [smem:[#allocation8]] %s158_s0 }
 0x10d   :  { %145 = dma.smem_to_hbm %s222_s1, 16, %s249_s2, [#allocation5]  }
 0x10e   :  { %218 = dma.done.wait [#allocation5], 16  }
 0x10f   :  { %219 = vsyncadd [#allocation5], 4294967280 }
 0x110   :  { %149 = sfence }
 0x111   :  { %150 = vsyncpa [#allocation4], 1 }
 0x112   :  { %151 = vsyncpa [#allocation7], 1 }
 0x113   :  { %152 = vsyncpa [#allocation5], 1 }

</bundles_post_ra>
